<compile_context>
chip_gen: v7x
topology: tpu7x:2x2x1
jax: 0.10.0
libtpu: 0.0.40
codegen_flags: <defaults>
</compile_context>

<pallas_src>
import functools

import jax
import jax.numpy as jnp
from jax.experimental import pallas as pl
from jax.experimental.pallas import tpu as pltpu

HIDDEN = 50
OUT = 6
H_PAD = 64    # hidden zero-padded to a sublane-friendly multiple of 8
OUT_PAD = 8   # fc3 outputs zero-padded to 8 (sublane dim of the q^T output)


def _round_up(x, m):
    return ((x + m - 1) // m) * m


def brain_kernel(x_ref, w1_ref, b1_ref, w2_ref, b2_ref, w3t_ref, b3t_ref, o_ref):
    """One batch tile of the 3-layer MLP; fc3 computed in transposed form.

    Matmul operands are cast to the weight dtype (no-op for f32 weights,
    bf16 feed for bf16 weights); accumulation, bias-add and ReLU stay f32.
    """
    x = x_ref[...]

    h1 = jnp.maximum(
        jnp.dot(x.astype(w1_ref.dtype), w1_ref[...],
                preferred_element_type=jnp.float32) + b1_ref[...], 0.0)
    h2 = jnp.maximum(
        jnp.dot(h1.astype(w2_ref.dtype), w2_ref[...],
                preferred_element_type=jnp.float32) + b2_ref[...], 0.0)

    # q^T[o, b] = sum_k w3t[o, k] * h2[b, k]  ("NT" matmul: contract dim 1 of
    # both operands).  Result [OUT_PAD, tb] is lane-dense (tb % 128 == 0), so
    # the store is an unmasked vst and the HBM writeback is 8 rows instead of
    # a 128-wide padded slab.
    q_t = jax.lax.dot_general(
        w3t_ref[...], h2.astype(w3t_ref.dtype),
        dimension_numbers=(((1,), (1,)), ((), ())),
        preferred_element_type=jnp.float32)
    o_ref[...] = q_t + b3t_ref[...]


def _choose_batch_tile(batch, batch_tile):
    """Pick a lane-dense batch tile (multiple of 128) and the padded batch."""
    padded = _round_up(batch, 128)
    if padded <= 128:
        return 128, 128
    # Prefer >=2 grid steps (v7x has 2 TensorCores to shard the "parallel"
    # axis over), capped by batch_tile (512-1024 amortizes the ~0.35 us/step
    # pipeline overhead; VMEM is never a constraint at these sizes).
    half = _round_up((padded + 1) // 2, 128)
    tb = max(128, min(batch_tile, half))
    return tb, _round_up(padded, tb)


@functools.partial(jax.jit, static_argnames=("batch_tile",))
def brain_forward(view, packed_params, *, batch_tile=1024):
    """view: [batch, vision_size] f32 -> q_values: [batch, 6] f32."""
    w1, b1, w2, b2, w3t, b3t = packed_params
    batch, vision = view.shape

    tb, padded = _choose_batch_tile(batch, batch_tile)
    if padded != batch:
        view = jnp.pad(view, ((0, padded - batch), (0, 0)))

    def full(a):
        nd = a.ndim
        return pl.BlockSpec(a.shape, lambda i, _nd=nd: (0,) * _nd)

    out_t = pl.pallas_call(
        brain_kernel,
        out_shape=jax.ShapeDtypeStruct((OUT_PAD, padded), jnp.float32),
        grid_spec=pl.GridSpec(
            grid=(padded // tb,),
            in_specs=[pl.BlockSpec((tb, vision), lambda i: (i, 0)),
                      full(w1), full(b1),
                      full(w2), full(b2),
                      full(w3t), full(b3t)],
            out_specs=pl.BlockSpec((OUT_PAD, tb), lambda i: (0, i)),
        ),
        compiler_params=pltpu.CompilerParams(
            dimension_semantics=("parallel",)),
    )(view, w1, b1, w2, b2, w3t, b3t)

    # [OUT_PAD, padded] -> [batch, OUT]; slice + transpose fuse under jit and
    # touch only ~56 B/row vs the 512 B/row padded writeback of the old layout.
    return out_t[:OUT, :batch].T


def init_brain_params(key, vision_size, hidden=HIDDEN, out=OUT):
    """PyTorch nn.Linear default init: U[-1/sqrt(fan_in), +1/sqrt(fan_in)].

    Weights are returned in [in_features, out_features] layout (i.e. W^T of
    torch's [out, in]); biases are [1, out_features].  All f32.
    """
    def linear(k, fan_in, fan_out):
        kw, kb = jax.random.split(k)
        bound = 1.0 / (fan_in ** 0.5)
        w = jax.random.uniform(kw, (fan_in, fan_out), jnp.float32, -bound, bound)
        b = jax.random.uniform(kb, (1, fan_out), jnp.float32, -bound, bound)
        return w, b

    k1, k2, k3 = jax.random.split(key, 3)
    w1, b1 = linear(k1, vision_size, hidden)
    w2, b2 = linear(k2, hidden, hidden)
    w3, b3 = linear(k3, hidden, out)
    return (w1, b1, w2, b2, w3, b3)


def pack_brain_params(params, weight_dtype=jnp.float32):
    """One-time layout pass (hoisted out of the per-call path):
      * zero-pad hidden 50->64 and out 6->8 (numerically identical:
        ReLU(0+0)=0 and zero rows/cols contribute nothing),
      * store fc3 transposed as [OUT_PAD, H_PAD] / [OUT_PAD, 1] so the kernel
        emits q^T with an NT matmul,
      * optionally cast weights to bf16 (v6e/v7x); biases stay f32.
    """
    w1, b1, w2, b2, w3, b3 = params
    hp = H_PAD - w1.shape[1]
    op = OUT_PAD - w3.shape[1]
    w1p = jnp.pad(w1, ((0, 0), (0, hp))).astype(weight_dtype)
    b1p = jnp.pad(b1, ((0, 0), (0, hp)))
    w2p = jnp.pad(w2, ((0, hp), (0, hp))).astype(weight_dtype)
    b2p = jnp.pad(b2, ((0, 0), (0, hp)))
    w3t = jnp.pad(w3, ((0, hp), (0, op))).T.astype(weight_dtype)  # [OUT_PAD, H_PAD]
    b3t = jnp.pad(b3, ((0, 0), (0, op))).T                        # [OUT_PAD, 1]
    return (w1p, b1p, w2p, b2p, w3t, b3t)


def brain_reference(view, params, weight_dtype=jnp.float32):
    """Pure-JAX reference using the same operand dtypes / f32 accumulation."""
    w1, b1, w2, b2, w3, b3 = params

    def lin(x, w, b):
        return jnp.dot(x.astype(weight_dtype), w.astype(weight_dtype),
                       preferred_element_type=jnp.float32) + b

    h1 = jnp.maximum(lin(view, w1, b1), 0.0)
    h2 = jnp.maximum(lin(h1, w2, b2), 0.0)
    return lin(h2, w3, b3)


if __name__ == "__main__":
    key = jax.random.PRNGKey(0)
    k_params, k_in1, k_in2 = jax.random.split(key, 3)

    vision_size = 32
    raw_params = init_brain_params(k_params, vision_size)

    # --- f32 weights: PyTorch forward semantics (default TPU dot precision) ---
    packed_f32 = pack_brain_params(raw_params, jnp.float32)

    view_small = jax.random.normal(k_in1, (4, vision_size), dtype=jnp.float32)
    q_small = jax.block_until_ready(brain_forward(view_small, packed_f32))
    ref_small = brain_reference(view_small, raw_params)
    assert q_small.shape == (4, OUT)
    assert jnp.allclose(q_small, ref_small, atol=1e-4, rtol=1e-4)

    # Multi-tile batch: >=2 grid steps so both v7x TensorCores get work.
    view_big = jax.random.normal(k_in2, (300, vision_size), dtype=jnp.float32)
    q_big = jax.block_until_ready(brain_forward(view_big, packed_f32))
    ref_big = brain_reference(view_big, raw_params)
    assert q_big.shape == (300, OUT)
    assert jnp.allclose(q_big, ref_big, atol=1e-4, rtol=1e-4)

    # --- bf16 weights (v6e/v7x MXU-native path), f32 accumulate/bias/ReLU ---
    packed_bf16 = pack_brain_params(raw_params, jnp.bfloat16)
    q_bf16 = jax.block_until_ready(brain_forward(view_big, packed_bf16))
    ref_bf16 = brain_reference(view_big, raw_params, weight_dtype=jnp.bfloat16)
    assert jnp.allclose(q_bf16, ref_bf16, atol=5e-3, rtol=5e-2)

    print("KERNEL_OK")
</pallas_src>

<mosaic_0001>
module attributes {stable_mosaic.version = 11 : i64} {
  func.func @brain_kernel(%arg0: i32, %arg1: memref<128x32xf32, #tpu.memory_space<vmem>>, %arg2: memref<32x64xf32, #tpu.memory_space<vmem>>, %arg3: memref<1x64xf32, #tpu.memory_space<vmem>>, %arg4: memref<64x64xf32, #tpu.memory_space<vmem>>, %arg5: memref<1x64xf32, #tpu.memory_space<vmem>>, %arg6: memref<8x64xf32, #tpu.memory_space<vmem>>, %arg7: memref<8x1xf32, #tpu.memory_space<vmem>>, %arg8: memref<8x128xf32, #tpu.memory_space<vmem>>) attributes {dimension_semantics = [#tpu.dimension_semantics<parallel>], iteration_bounds = array<i64: 1>, scalar_prefetch = 0 : i64, scratch_operands = 0 : i64, tpu.core_type = #tpu.core_type<tc>, window_params = [{transform_indices = @transform_0, window_bounds = array<i64: 128, 32>}, {pipeline_mode = #tpu.pipeline_mode<synchronous>, transform_indices = @transform_1, window_bounds = array<i64: 32, 64>}, {pipeline_mode = #tpu.pipeline_mode<synchronous>, transform_indices = @transform_2, window_bounds = array<i64: 1, 64>}, {pipeline_mode = #tpu.pipeline_mode<synchronous>, transform_indices = @transform_3, window_bounds = array<i64: 64, 64>}, {pipeline_mode = #tpu.pipeline_mode<synchronous>, transform_indices = @transform_4, window_bounds = array<i64: 1, 64>}, {pipeline_mode = #tpu.pipeline_mode<synchronous>, transform_indices = @transform_5, window_bounds = array<i64: 8, 64>}, {pipeline_mode = #tpu.pipeline_mode<synchronous>, transform_indices = @transform_6, window_bounds = array<i64: 8, 1>}, {transform_indices = @transform_7, window_bounds = array<i64: 8, 128>}]} {
    %c0 = arith.constant 0 : index
    %c0_0 = arith.constant 0 : index
    %0 = vector.load %arg1[%c0, %c0_0] : memref<128x32xf32, #tpu.memory_space<vmem>>, vector<128x32xf32>
    %c0_1 = arith.constant 0 : index
    %c0_2 = arith.constant 0 : index
    %1 = vector.load %arg2[%c0_1, %c0_2] : memref<32x64xf32, #tpu.memory_space<vmem>>, vector<32x64xf32>
    %cst = arith.constant dense<0.000000e+00> : vector<128x64xf32>
    %2 = tpu.matmul %0, %1, %cst {dimension_numbers = #tpu.dot_dimension_numbers<[1], [0], [0], [1], [0, 0, 1, 1], [], []>} : vector<128x32xf32>, vector<32x64xf32>, vector<128x64xf32> -> vector<128x64xf32>
    %c0_3 = arith.constant 0 : index
    %c0_4 = arith.constant 0 : index
    %3 = vector.load %arg3[%c0_3, %c0_4] : memref<1x64xf32, #tpu.memory_space<vmem>>, vector<1x64xf32>
    %4 = vector.broadcast %3 : vector<1x64xf32> to vector<128x64xf32>
    %5 = arith.addf %2, %4 : vector<128x64xf32>
    %cst_5 = arith.constant 0.000000e+00 : f32
    %6 = vector.broadcast %cst_5 : f32 to vector<128x64xf32>
    %7 = arith.maximumf %5, %6 : vector<128x64xf32>
    %c0_6 = arith.constant 0 : index
    %c0_7 = arith.constant 0 : index
    %8 = vector.load %arg4[%c0_6, %c0_7] : memref<64x64xf32, #tpu.memory_space<vmem>>, vector<64x64xf32>
    %cst_8 = arith.constant dense<0.000000e+00> : vector<128x64xf32>
    %9 = tpu.matmul %7, %8, %cst_8 {dimension_numbers = #tpu.dot_dimension_numbers<[1], [0], [0], [1], [0, 0, 1, 1], [], []>} : vector<128x64xf32>, vector<64x64xf32>, vector<128x64xf32> -> vector<128x64xf32>
    %c0_9 = arith.constant 0 : index
    %c0_10 = arith.constant 0 : index
    %10 = vector.load %arg5[%c0_9, %c0_10] : memref<1x64xf32, #tpu.memory_space<vmem>>, vector<1x64xf32>
    %11 = vector.broadcast %10 : vector<1x64xf32> to vector<128x64xf32>
    %12 = arith.addf %9, %11 : vector<128x64xf32>
    %cst_11 = arith.constant 0.000000e+00 : f32
    %13 = vector.broadcast %cst_11 : f32 to vector<128x64xf32>
    %14 = arith.maximumf %12, %13 : vector<128x64xf32>
    %c0_12 = arith.constant 0 : index
    %c0_13 = arith.constant 0 : index
    %15 = vector.load %arg6[%c0_12, %c0_13] : memref<8x64xf32, #tpu.memory_space<vmem>>, vector<8x64xf32>
    %cst_14 = arith.constant dense<0.000000e+00> : vector<8x128xf32>
    %16 = tpu.matmul %15, %14, %cst_14 {dimension_numbers = #tpu.dot_dimension_numbers<[1], [1], [0], [0], [0, 0, 1, 0], [], []>} : vector<8x64xf32>, vector<128x64xf32>, vector<8x128xf32> -> vector<8x128xf32>
    %c0_15 = arith.constant 0 : index
    %c0_16 = arith.constant 0 : index
    %17 = vector.load %arg7[%c0_15, %c0_16] : memref<8x1xf32, #tpu.memory_space<vmem>>, vector<8x1xf32>
    %18 = vector.broadcast %17 : vector<8x1xf32> to vector<8x128xf32>
    %19 = arith.addf %16, %18 : vector<8x128xf32>
    %c0_17 = arith.constant 0 : index
    %c0_18 = arith.constant 0 : index
    %20 = vector.load %arg8[%c0_17, %c0_18] : memref<8x128xf32, #tpu.memory_space<vmem>>, vector<8x128xf32>
    tpu.vector_store %arg8[%c0_17, %c0_18], %19 {strides = array<i32>} : memref<8x128xf32, #tpu.memory_space<vmem>>, vector<8x128xf32>,
    return
  }
  func.func @transform_0(%arg0: i32) -> (i32, i32) {
    %c0_i32 = arith.constant 0 : i32
    %c0_i32_0 = arith.constant 0 : i32
    return %arg0, %c0_i32 : i32, i32
  }
  func.func @transform_1(%arg0: i32) -> (i32, i32) {
    %c0_i32 = arith.constant 0 : i32
    %c0_i32_0 = arith.constant 0 : i32
    %c0_i32_1 = arith.constant 0 : i32
    return %c0_i32, %c0_i32_0 : i32, i32
  }
  func.func @transform_2(%arg0: i32) -> (i32, i32) {
    %c0_i32 = arith.constant 0 : i32
    %c0_i32_0 = arith.constant 0 : i32
    %c0_i32_1 = arith.constant 0 : i32
    return %c0_i32, %c0_i32_0 : i32, i32
  }
  func.func @transform_3(%arg0: i32) -> (i32, i32) {
    %c0_i32 = arith.constant 0 : i32
    %c0_i32_0 = arith.constant 0 : i32
    %c0_i32_1 = arith.constant 0 : i32
    return %c0_i32, %c0_i32_0 : i32, i32
  }
  func.func @transform_4(%arg0: i32) -> (i32, i32) {
    %c0_i32 = arith.constant 0 : i32
    %c0_i32_0 = arith.constant 0 : i32
    %c0_i32_1 = arith.constant 0 : i32
    return %c0_i32, %c0_i32_0 : i32, i32
  }
  func.func @transform_5(%arg0: i32) -> (i32, i32) {
    %c0_i32 = arith.constant 0 : i32
    %c0_i32_0 = arith.constant 0 : i32
    %c0_i32_1 = arith.constant 0 : i32
    return %c0_i32, %c0_i32_0 : i32, i32
  }
  func.func @transform_6(%arg0: i32) -> (i32, i32) {
    %c0_i32 = arith.constant 0 : i32
    %c0_i32_0 = arith.constant 0 : i32
    %c0_i32_1 = arith.constant 0 : i32
    return %c0_i32, %c0_i32_0 : i32, i32
  }
  func.func @transform_7(%arg0: i32) -> (i32, i32) {
    %c0_i32 = arith.constant 0 : i32
    %c0_i32_0 = arith.constant 0 : i32
    return %c0_i32, %arg0 : i32, i32
  }
}

</mosaic_0001>

<bundles_post_ra>
// kernel: brain_forward.1
= control target key start
LH: loop header
LB: loop body
LE: loop exit
PB: predicated region body
PF: predicated region fallthrough
CT: control target
= control target key end

     0   :  { %vm53_vm0 = vcmask 261120   ;;  %vm278_vm1 = vcmask 523264   ;;  %vm902_vm2 = vmmov 0   ;;  %s1107_s1 = inlined_call_operand.vmem [shape: f32[32,64], index: 1, kind: input, shape index: {}]   ;;  %s1108_s0 = inlined_call_operand.vmem [shape: f32[128,32], index: 0, kind: input, shape index: {}]   ;;  %s1109_s3 = inlined_call_operand.vmem [shape: f32[64,64], index: 3, kind: input, shape index: {}]   ;;  %s1110_s2 = inlined_call_operand.vmem [shape: f32[1,64], index: 2, kind: input, shape index: {}]   ;;  %s1111_s6 = inlined_call_operand.vmem [shape: f32[8,1], index: 6, kind: input, shape index: {}]   ;;  %s1112_s4 = inlined_call_operand.vmem [shape: f32[1,64], index: 4, kind: input, shape index: {}]   ;;  %s1113_s5 = inlined_call_operand.vmem [shape: f32[8,64], index: 5, kind: input, shape index: {}]   ;;  %s1114_s7 = inlined_call_operand.vmem [shape: f32[8,128], index: 7, kind: output, shape index: {}]  }
   0x1   :  { %v42_v0 = vld [vmem:[%s1107_s1] sm:$0xff]  ;;  %v43_v1 = vld [vmem:[%s1107_s1 + $0x8] sm:$0xff]  ;;  %v44_v2 = vld [vmem:[%s1107_s1 + $0x10] sm:$0xff] }
   0x2   :  { %v840_v3 = vpack.c.bf16 %v43_v1, %v42_v0  ;;  %v45_v4 = vld [vmem:[%s1107_s1 + $0x18] sm:$0xff]  ;;  %v26_v5 = vld [vmem:[%s1108_s0] sm:$0xff]  ;;  %v264_v8 = vld [vmem:[%s1109_s3 + $0x8] sm:$0xff] }
   0x3   :  { %v844_v6 = vpack.c.bf16 %v45_v4, %v44_v2  ;;  %741 = vmatprep.mubr.msk.f32.mxu1 %vm53_vm0, %v26_v5  ;;  %v263_v7 = vld [vmem:[%s1109_s3] sm:$0xff]  ;;  %v265_v9 = vld [vmem:[%s1109_s3 + $0x10] sm:$0xff]  ;;  %v266_v10 = vld [vmem:[%s1109_s3 + $0x18] sm:$0xff] }
   0x4   :  { %841 = vmatprep.subr.bf16.mxu1 %v840_v3  ;;  %v27_v11 = vld [vmem:[%s1108_s0 + $0x8] sm:$0xff]  ;;  %v848_v12 = vpack.c.bf16 %v264_v8, %v263_v7  ;;  %v28_v13 = vld [vmem:[%s1108_s0 + $0x10] sm:$0xff]  ;;  %v852_v14 = vpack.c.bf16 %v266_v10, %v265_v9  ;;  %v267_v15 = vld [vmem:[%s1109_s3 + $0x20] sm:$0xff] }
   0x5   :  { %843 = vmatpush3.bf16.msra.mxu1 %v840_v3  ;;  %v268_v16 = vld [vmem:[%s1109_s3 + $0x28] sm:$0xff]  ;;  %v29_v17 = vld [vmem:[%s1108_s0 + $0x18] sm:$0xff]  ;;  %v30_v18 = vld [vmem:[%s1108_s0 + $0x20] sm:$0xff] }
   0x6   :  { %845 = vmatprep.subr.bf16.mxu1 %v844_v6  ;;  %v856_v19 = vpack.c.bf16 %v268_v16, %v267_v15  ;;  %v269_v20 = vld [vmem:[%s1109_s3 + $0x30] sm:$0xff]  ;;  %v270_v21 = vld [vmem:[%s1109_s3 + $0x38] sm:$0xff]  ;;  %v31_v22 = vld [vmem:[%s1108_s0 + $0x28] sm:$0xff] }
   0x7   :  { %v32_v23 = vld [vmem:[%s1108_s0 + $0x30] sm:$0xff]  ;;  %v860_v24 = vpack.c.bf16 %v270_v21, %v269_v20  ;;  %v33_v25 = vld [vmem:[%s1108_s0 + $0x38] sm:$0xff]  ;;  %v34_v26 = vld [vmem:[%s1108_s0 + $0x40] sm:$0xff]  ;;  %v903_v20 = vmov 0.0   ;;  %v904_v21 = vmov 0  }
   0x8   :  { %v35_v27 = vld [vmem:[%s1108_s0 + $0x48] sm:$0xff]  ;;  %v36_v28 = vld [vmem:[%s1108_s0 + $0x50] sm:$0xff]  ;;  %v37_v29 = vld [vmem:[%s1108_s0 + $0x58] sm:$0xff]  ;;  %837 = vmatprep.mubr.msk.f32.mxu0 %vm902_vm2, %v903_v20  ;;  %900 = vset.pattern.permute.xlu0 %v904_v21 }
   0x9   :  { %847 = vmatpush3.bf16.msra.mxu1 %v844_v6  ;;  %v38_v30 = vld [vmem:[%s1108_s0 + $0x60] sm:$0xff]  ;;  %v39_v31 = vld [vmem:[%s1108_s0 + $0x68] sm:$0xff]  ;;  %v40_v32 = vld [vmem:[%s1108_s0 + $0x70] sm:$0xff] }
   0xa   :  { %849 = vmatprep.subr.bf16.mxu1 %v848_v12  ;;  %v41_v33 = vld [vmem:[%s1108_s0 + $0x78] sm:$0xff]  ;;  %v621_v34 = vld [vmem:[%s1110_s2] ss:$0 sm:$0xff]  ;;  %vm1073_vm3 = vmpackc.low %vm278_vm1, %vm278_vm1 }
   0xc   :  { %742 = vmatmul.mubr.msk.f32.vlgmr.msra.gmra.mrb[0].mxu1 %vm53_vm0, %v27_v11 }
   0xd   :  { %744 = vmatprep.mubr.msk.f32.mxu1 %vm53_vm0, %v28_v13  ;;  %851 = vmatpush3.bf16.msra.mxu1 %v848_v12 }
   0xe   :  { %853 = vmatprep.subr.bf16.mxu1 %v852_v14 }
  0x10   :  { %745 = vmatmul.mubr.msk.f32.gmra.mrb[2].mxu1 %vm53_vm0, %v29_v17 }
  0x11   :  { %747 = vmatprep.mubr.msk.f32.mxu1 %vm53_vm0, %v30_v18  ;;  %855 = vmatpush3.bf16.msra.mxu1 %v852_v14 }
  0x12   :  { %857 = vmatprep.subr.bf16.mxu1 %v856_v19 }
  0x14   :  { %748 = vmatmul.mubr.msk.f32.gmra.mrb[4].mxu1 %vm53_vm0, %v31_v22  ;;  %v489_v22 = vld [vmem:[%s1111_s6] sm:$0xff] }
  0x15   :  { %750 = vmatprep.mubr.msk.f32.mxu1 %vm53_vm0, %v32_v23  ;;  %859 = vmatpush3.bf16.msra.mxu1 %v856_v19  ;;  %v901_v19 = vmov 0.0|0.0   ;;  %v638_v23 = vld [vmem:[%s1112_s4] ss:$0 sm:$0xff] }
  0x16   :  { %861 = vmatprep.subr.bf16.mxu1 %v860_v24  ;;  %864 = vmatprep.subr.bf16.mxu0 %v901_v19 }
  0x17   :  { %492 = vperm.xlu0 %900, %v489_v22  }
  0x18   :  { %751 = vmatmul.mubr.msk.f32.gmra.mrb[6].mxu1 %vm53_vm0, %v33_v25 }
  0x19   :  { %753 = vmatprep.mubr.msk.f32.mxu1 %vm53_vm0, %v34_v26  ;;  %863 = vmatpush3.bf16.msra.mxu1 %v860_v24 }
  0x1c   :  { %754 = vmatmul.mubr.msk.f32.gmra.mrb[8].mxu1 %vm53_vm0, %v35_v27 }
  0x1d   :  { %756 = vmatprep.mubr.msk.f32.mxu1 %vm53_vm0, %v36_v28 }
  0x20   :  { %757 = vmatmul.mubr.msk.f32.gmra.mrb[10].mxu1 %vm53_vm0, %v37_v29 }
  0x21   :  { %759 = vmatprep.mubr.msk.f32.mxu1 %vm53_vm0, %v38_v30 }
  0x24   :  { %760 = vmatmul.mubr.msk.f32.gmra.mrb[12].mxu1 %vm53_vm0, %v39_v31 }
  0x25   :  { %762 = vmatprep.mubr.msk.f32.mxu1 %vm53_vm0, %v40_v32 }
  0x28   :  { %763 = vmatmul.mubr.msk.f32.gmra.mrb[14].mxu1 %vm53_vm0, %v41_v33 }
  0xdf   :  { %v743_v35 = vpop.f32.mrb[0].mxu1 }
  0xe0   :  { %v174_v36 = vadd.f32 %v743_v35, %v621_v34  ;;  %v168_v37 = vpop.f32.mrb[1].mxu1 }
  0xe1   :  { %v169_v38 = vadd.f32 %v621_v34, %v168_v37 }
  0xe2   :  { %v248_v41 = vmax.f32 %v174_v36, 0.0 }
  0xe3   :  { %v247_v39 = vmax.f32 %v169_v38, 0.0  ;;  %v746_v40 = vpop.f32.mrb[2].mxu1 }
  0xe4   :  { %v184_v42 = vadd.f32 %v746_v40, %v621_v34  ;;  %v178_v43 = vpop.f32.mrb[3].mxu1 }
  0xe5   :  { %v179_v44 = vadd.f32 %v621_v34, %v178_v43  ;;  %781 = vmatprep.mubr.msk.f32.mxu1 %vm278_vm1, %v247_v39 }
  0xe6   :  { %v250_v45 = vmax.f32 %v184_v42, 0.0  ;;  %782 = vmatmul.mubr.msk.f32.vlgmr.msra.gmra.mrb[16].mxu1 %vm278_vm1, %v248_v41 }
  0xe7   :  { %v249_v46 = vmax.f32 %v179_v44, 0.0  ;;  %v749_v47 = vpop.f32.mrb[4].mxu1 }
  0xe8   :  { %v194_v48 = vadd.f32 %v749_v47, %v621_v34  ;;  %v188_v49 = vpop.f32.mrb[5].mxu1 }
  0xe9   :  { %784 = vmatprep.mubr.msk.f32.mxu1 %vm278_vm1, %v249_v46  ;;  %v189_v50 = vadd.f32 %v621_v34, %v188_v49 }
  0xea   :  { %785 = vmatmul.mubr.msk.f32.gmra.mrb[18].mxu1 %vm278_vm1, %v250_v45  ;;  %v252_v51 = vmax.f32 %v194_v48, 0.0 }
  0xeb   :  { %v251_v52 = vmax.f32 %v189_v50, 0.0  ;;  %v752_v53 = vpop.f32.mrb[6].mxu1 }
  0xec   :  { %v204_v54 = vadd.f32 %v752_v53, %v621_v34  ;;  %v198_v55 = vpop.f32.mrb[7].mxu1 }
  0xed   :  { %787 = vmatprep.mubr.msk.f32.mxu1 %vm278_vm1, %v251_v52  ;;  %v199_v56 = vadd.f32 %v621_v34, %v198_v55 }
  0xee   :  { %788 = vmatmul.mubr.msk.f32.gmra.mrb[20].mxu1 %vm278_vm1, %v252_v51  ;;  %v254_v57 = vmax.f32 %v204_v54, 0.0 }
  0xef   :  { %v253_v58 = vmax.f32 %v199_v56, 0.0  ;;  %v755_v59 = vpop.f32.mrb[8].mxu1 }
  0xf0   :  { %v214_v60 = vadd.f32 %v755_v59, %v621_v34  ;;  %v208_v61 = vpop.f32.mrb[9].mxu1 }
  0xf1   :  { %790 = vmatprep.mubr.msk.f32.mxu1 %vm278_vm1, %v253_v58  ;;  %v209_v62 = vadd.f32 %v621_v34, %v208_v61 }
  0xf2   :  { %791 = vmatmul.mubr.msk.f32.gmra.mrb[22].mxu1 %vm278_vm1, %v254_v57  ;;  %v256_v63 = vmax.f32 %v214_v60, 0.0 }
  0xf3   :  { %v255_v0 = vmax.f32 %v209_v62, 0.0  ;;  %v758_v1 = vpop.f32.mrb[10].mxu1 }
  0xf4   :  { %v224_v2 = vadd.f32 %v758_v1, %v621_v34  ;;  %v218_v3 = vpop.f32.mrb[11].mxu1 }
  0xf5   :  { %793 = vmatprep.mubr.msk.f32.mxu1 %vm278_vm1, %v255_v0  ;;  %v219_v4 = vadd.f32 %v621_v34, %v218_v3 }
  0xf6   :  { %794 = vmatmul.mubr.msk.f32.gmra.mrb[24].mxu1 %vm278_vm1, %v256_v63  ;;  %v258_v5 = vmax.f32 %v224_v2, 0.0 }
  0xf7   :  { %v257_v6 = vmax.f32 %v219_v4, 0.0  ;;  %v761_v7 = vpop.f32.mrb[12].mxu1 }
  0xf8   :  { %v234_v8 = vadd.f32 %v761_v7, %v621_v34  ;;  %v228_v9 = vpop.f32.mrb[13].mxu1 }
  0xf9   :  { %796 = vmatprep.mubr.msk.f32.mxu1 %vm278_vm1, %v257_v6  ;;  %v229_v10 = vadd.f32 %v621_v34, %v228_v9 }
  0xfa   :  { %797 = vmatmul.mubr.msk.f32.gmra.mrb[26].mxu1 %vm278_vm1, %v258_v5  ;;  %v260_v11 = vmax.f32 %v234_v8, 0.0 }
  0xfb   :  { %v259_v12 = vmax.f32 %v229_v10, 0.0  ;;  %v764_v13 = vpop.f32.mrb[14].mxu1 }
  0xfc   :  { %v244_v14 = vadd.f32 %v764_v13, %v621_v34  ;;  %v238_v15 = vpop.f32.mrb[15].mxu1 }
  0xfd   :  { %799 = vmatprep.mubr.msk.f32.mxu1 %vm278_vm1, %v259_v12  ;;  %v239_v16 = vadd.f32 %v621_v34, %v238_v15 }
  0xfe   :  { %800 = vmatmul.mubr.msk.f32.gmra.mrb[28].mxu1 %vm278_vm1, %v260_v11  ;;  %v262_v17 = vmax.f32 %v244_v14, 0.0 }
  0xff   :  { %v261_v18 = vmax.f32 %v239_v16, 0.0 }
 0x101   :  { %802 = vmatprep.mubr.msk.f32.mxu1 %vm278_vm1, %v261_v18  ;;  %v493_v18 = vpop.permute.xlu0 %492 }
 0x102   :  { %803 = vmatmul.mubr.msk.f32.gmra.mrb[30].mxu1 %vm278_vm1, %v262_v17  ;;  %v488_v17 = vld [vmem:[%s1113_s5] sm:$0xff] }
 0x1b9   :  { %v783_v24 = vpop.f32.mrb[16].mxu1 }
 0x1ba   :  { %v399_v25 = vadd.f32 %v783_v24, %v638_v23  ;;  %v393_v26 = vpop.f32.mrb[17].mxu1 }
 0x1bb   :  { %v394_v27 = vadd.f32 %v638_v23, %v393_v26 }
 0x1bc   :  { %v473_v28 = vmax.f32 %v399_v25, 0.0 }
 0x1bd   :  { %v472_v29 = vmax.f32 %v394_v27, 0.0  ;;  %v786_v30 = vpop.f32.mrb[18].mxu1 }
 0x1be   :  { %v409_v31 = vadd.f32 %v786_v30, %v638_v23  ;;  %v403_v32 = vpop.f32.mrb[19].mxu1 }
 0x1bf   :  { %v865_v34 = vpack.c.bf16 %v473_v28, %v472_v29  ;;  %v404_v35 = vadd.f32 %v638_v23, %v403_v32 }
 0x1c0   :  { %v475_v36 = vmax.f32 %v409_v31, 0.0 }
 0x1c1   :  { %v474_v37 = vmax.f32 %v404_v35, 0.0  ;;  %867 = vmatpush3.bf16.xpose.msk.msra.mxu0 %vm1073_vm3, %v865_v34  ;;  %v789_v38 = vpop.f32.mrb[20].mxu1 }
 0x1c2   :  { %v419_v39 = vadd.f32 %v789_v38, %v638_v23  ;;  %v413_v40 = vpop.f32.mrb[21].mxu1  ;;  %868 = vmatprep.subr.bf16.mxu0 %v901_v19 }
 0x1c3   :  { %v869_v41 = vpack.c.bf16 %v475_v36, %v474_v37  ;;  %v414_v42 = vadd.f32 %v638_v23, %v413_v40 }
 0x1c4   :  { %v477_v43 = vmax.f32 %v419_v39, 0.0 }
 0x1c5   :  { %v476_v44 = vmax.f32 %v414_v42, 0.0  ;;  %v792_v45 = vpop.f32.mrb[22].mxu1 }
 0x1c6   :  { %v429_v46 = vadd.f32 %v792_v45, %v638_v23  ;;  %v423_v47 = vpop.f32.mrb[23].mxu1 }
 0x1c7   :  { %v873_v48 = vpack.c.bf16 %v477_v43, %v476_v44  ;;  %v424_v49 = vadd.f32 %v638_v23, %v423_v47 }
 0x1c8   :  { %v479_v50 = vmax.f32 %v429_v46, 0.0 }
 0x1c9   :  { %871 = vmatpush3.bf16.xpose.msk.msra.mxu0 %vm1073_vm3, %v869_v41  ;;  %v478_v51 = vmax.f32 %v424_v49, 0.0  ;;  %v795_v52 = vpop.f32.mrb[24].mxu1 }
 0x1ca   :  { %872 = vmatprep.subr.bf16.mxu0 %v901_v19  ;;  %v439_v53 = vadd.f32 %v795_v52, %v638_v23  ;;  %v433_v54 = vpop.f32.mrb[25].mxu1 }
 0x1cb   :  { %v877_v55 = vpack.c.bf16 %v479_v50, %v478_v51  ;;  %v434_v56 = vadd.f32 %v638_v23, %v433_v54 }
 0x1cc   :  { %v481_v57 = vmax.f32 %v439_v53, 0.0 }
 0x1cd   :  { %v480_v58 = vmax.f32 %v434_v56, 0.0  ;;  %v798_v59 = vpop.f32.mrb[26].mxu1 }
 0x1ce   :  { %v449_v60 = vadd.f32 %v798_v59, %v638_v23  ;;  %v443_v61 = vpop.f32.mrb[27].mxu1 }
 0x1cf   :  { %v881_v62 = vpack.c.bf16 %v481_v57, %v480_v58  ;;  %v444_v63 = vadd.f32 %v638_v23, %v443_v61 }
 0x1d0   :  { %v483_v0 = vmax.f32 %v449_v60, 0.0 }
 0x1d1   :  { %875 = vmatpush3.bf16.xpose.msk.msra.mxu0 %vm1073_vm3, %v873_v48  ;;  %v482_v1 = vmax.f32 %v444_v63, 0.0  ;;  %v801_v2 = vpop.f32.mrb[28].mxu1 }
 0x1d2   :  { %876 = vmatprep.subr.bf16.mxu0 %v901_v19  ;;  %v459_v3 = vadd.f32 %v801_v2, %v638_v23  ;;  %v453_v4 = vpop.f32.mrb[29].mxu1 }
 0x1d3   :  { %v885_v5 = vpack.c.bf16 %v483_v0, %v482_v1  ;;  %v454_v6 = vadd.f32 %v638_v23, %v453_v4 }
 0x1d4   :  { %v485_v7 = vmax.f32 %v459_v3, 0.0 }
 0x1d5   :  { %v484_v8 = vmax.f32 %v454_v6, 0.0  ;;  %v804_v9 = vpop.f32.mrb[30].mxu1 }
 0x1d6   :  { %v469_v10 = vadd.f32 %v804_v9, %v638_v23  ;;  %v463_v11 = vpop.f32.mrb[31].mxu1 }
 0x1d7   :  { %v889_v12 = vpack.c.bf16 %v485_v7, %v484_v8  ;;  %v464_v13 = vadd.f32 %v638_v23, %v463_v11 }
 0x1d8   :  { %v487_v14 = vmax.f32 %v469_v10, 0.0 }
 0x1d9   :  { %879 = vmatpush3.bf16.xpose.msk.msra.mxu0 %vm1073_vm3, %v877_v55  ;;  %v486_v15 = vmax.f32 %v464_v13, 0.0 }
 0x1da   :  { %880 = vmatprep.subr.bf16.mxu0 %v901_v19 }
 0x1db   :  { %v893_v16 = vpack.c.bf16 %v487_v14, %v486_v15 }
 0x1e1   :  { %883 = vmatpush3.bf16.xpose.msk.msra.mxu0 %vm1073_vm3, %v881_v62 }
 0x1e2   :  { %884 = vmatprep.subr.bf16.mxu0 %v901_v19 }
 0x1e9   :  { %887 = vmatpush3.bf16.xpose.msk.msra.mxu0 %vm1073_vm3, %v885_v5 }
 0x1ea   :  { %888 = vmatprep.subr.bf16.mxu0 %v901_v19 }
 0x1f1   :  { %891 = vmatpush3.bf16.xpose.msk.msra.mxu0 %vm1073_vm3, %v889_v12 }
 0x1f2   :  { %892 = vmatprep.subr.bf16.mxu0 %v901_v19 }
 0x1f9   :  { %895 = vmatpush3.bf16.xpose.msk.msra.mxu0 %vm1073_vm3, %v893_v16 }
 0x200   :  { %838 = vmatmul.mubr.msk.f32.vlgmr.msra.gmra.mrb[0].mxu0 %vm278_vm1, %v488_v17 }
 0x2d3   :  { %v612_v20 = vpop.f32.mrb[0].mxu0 }
 0x2d4   :  { %v613_v21 = vadd.f32 %v612_v20, %v493_v18  ;;  %v839_v22 = vpop.f32.mrb[1].mxu0 }
 0x2d6   :  { %616 = vst [vmem:[%s1114_s7] sm:$0xff] %v613_v21 }

</bundles_post_ra>
